<compile_context>
chip_gen: v7x
topology: tpu7x:2x2x1
jax: 0.10.0
libtpu: 0.0.40
codegen_flags: <defaults>
</compile_context>

<pallas_src>
import math

import jax
import jax.numpy as jnp
import numpy as np
from jax.experimental import pallas as pl
from jax.experimental.pallas import tpu as pltpu


def conv_residual_block_kernel(x0_ref, adj_ref, w1_ref, b1_ref, w2_ref, b2_ref,
                               bng_ref, bnb_ref, out_ref, asum_ref):
    x0 = x0_ref[...]                       # [N, F] f32
    n, f = x0.shape
    adj_mask = adj_ref[...] > 0            # [N, N] bool; the ONLY adjacency rep kept live
    inv_sqrt_f = 1.0 / math.sqrt(f)
    eps = 1e-5

    def transformer_conv(x, w_ref, b_ref):
        # Fused projection: one [N, 4F] matmul (4F = 128 -> lane-dense MXU pass),
        # then static lane slices for q / k / v / skip.
        y = jnp.dot(x, w_ref[...], preferred_element_type=jnp.float32) + b_ref[...]
        q = y[:, 0 * f:1 * f]
        k = y[:, 1 * f:2 * f]
        v = y[:, 2 * f:3 * f]
        skip = y[:, 3 * f:4 * f]
        # scores[i, j] = <q_i, k_j> / sqrt(F)
        s = jnp.einsum('if,jf->ij', q, k,
                       preferred_element_type=jnp.float32) * inv_sqrt_f
        s_masked = jnp.where(adj_mask, s, jnp.float32(-1e30))
        row_max = jnp.max(s_masked, axis=-1, keepdims=True)
        # vsel on the existing mask instead of a separate 0/1 f32 multiplier.
        e = jnp.where(adj_mask, jnp.exp(s_masked - row_max), 0.0)
        denom = jnp.sum(e, axis=-1, keepdims=True)
        denom_safe = jnp.where(denom > 0, denom, 1.0)
        # EUP approximate reciprocal + one Newton step -> ~f32-exact (fixes the 1e-3 miss).
        r = pl.reciprocal(denom_safe, approx=True)
        r = r * (2.0 - denom_safe * r)
        alpha = e * r
        agg = jnp.dot(alpha, v, preferred_element_type=jnp.float32)
        return agg + skip, alpha

    def batchnorm(x, gamma, beta):
        # Single-pass statistics: sum and sum-of-squares in one traversal.
        inv_n = 1.0 / x.shape[0]
        s1 = jnp.sum(x, axis=0, keepdims=True)
        s2 = jnp.sum(x * x, axis=0, keepdims=True)
        mean = s1 * inv_n
        var = jnp.maximum(s2 * inv_n - mean * mean, 0.0)
        return (x - mean) * jax.lax.rsqrt(var + eps) * gamma + beta

    # conv1 -> (alpha1 written out immediately) -> bn1 -> relu
    h, a1 = transformer_conv(x0, w1_ref, b1_ref)
    asum_ref[...] = a1                     # end a1's [N,N] live range before conv2
    h = jnp.maximum(batchnorm(h, bng_ref[0:1, :], bnb_ref[0:1, :]), 0.0)
    # conv2 -> accumulate alpha2 -> bn2 -> residual -> relu
    h2, a2 = transformer_conv(h, w2_ref, b2_ref)
    asum_ref[...] += a2                    # summed attention accumulated in-place
    h2 = batchnorm(h2, bng_ref[1:2, :], bnb_ref[1:2, :])
    out_ref[...] = jnp.maximum(h2 + x0, 0.0)


def conv_residual_block_pallas(x0, adj_bf16, w1f, b1f, w2f, b2f, bng, bnb):
    n, f = x0.shape

    def spec(shape):
        return pl.BlockSpec(shape, lambda i, _s=shape: (0,) * len(_s))

    return pl.pallas_call(
        conv_residual_block_kernel,
        grid=(1,),
        in_specs=[spec(x0.shape), spec(adj_bf16.shape),
                  spec(w1f.shape), spec(b1f.shape),
                  spec(w2f.shape), spec(b2f.shape),
                  spec(bng.shape), spec(bnb.shape)],
        out_specs=(spec((n, f)), spec((n, n))),
        out_shape=(jax.ShapeDtypeStruct((n, f), jnp.float32),
                   jax.ShapeDtypeStruct((n, n), jnp.float32)),
        compiler_params=pltpu.CompilerParams(
            dimension_semantics=("arbitrary",)),
    )(x0, adj_bf16, w1f, b1f, w2f, b2f, bng, bnb)


def conv_residual_block_forward(x0, edges, params):
    """Glue: dense adjacency build, weight fusion, per-edge alpha gather (plain JAX)."""
    w1, b1, w2, b2, bng, bnb = params       # w: [4,F,F] (q,k,v,skip), b: [4,F]
    n, f = x0.shape
    src, dst = edges[0], edges[1]           # PyG: edge j -> i is (src, dst)
    adj = jnp.zeros((n, n), jnp.float32).at[dst, src].set(1.0).astype(jnp.bfloat16)

    # Fuse q/k/v/skip into one [F, 4F] matrix per conv (lane-dense 4F = 128 output).
    w1f = jnp.concatenate([w1[0], w1[1], w1[2], w1[3]], axis=1)   # [F, 4F]
    w2f = jnp.concatenate([w2[0], w2[1], w2[2], w2[3]], axis=1)   # [F, 4F]
    b1f = b1.reshape(1, 4 * f)                                    # [1, 4F]
    b2f = b2.reshape(1, 4 * f)                                    # [1, 4F]

    x_out, a_sum_dense = conv_residual_block_pallas(
        x0, adj, w1f, b1f, w2f, b2f, bng, bnb)
    # TODO(synk): at realistic N, gather these E entries inside the kernel (scalar-prefetched
    #             edge indices) instead of streaming the dense [N,N] matrix to HBM.
    alpha_sum = a_sum_dense[dst, src][:, None]   # [E, 1] (heads=1), already a1+a2
    return x_out, (edges, alpha_sum)


def reference_forward(x0, edges, params):
    """Pure-JAX reference mirroring PyTorch/PyG semantics (unfused weights)."""
    w1, b1, w2, b2, bng, bnb = params
    n, f = x0.shape
    src, dst = edges[0], edges[1]
    adj = jnp.zeros((n, n), jnp.float32).at[dst, src].set(1.0)

    def tconv(x, w, b):
        q = x @ w[0] + b[0]
        k = x @ w[1] + b[1]
        v = x @ w[2] + b[2]
        s = (q @ k.T) / math.sqrt(f)
        sm = jnp.where(adj > 0, s, -1e30)
        e = jnp.exp(sm - sm.max(-1, keepdims=True)) * adj
        d = e.sum(-1, keepdims=True)
        alpha = e / jnp.where(d > 0, d, 1.0)
        return alpha @ v + x @ w[3] + b[3], alpha

    def bn(x, g, bta):
        m = x.mean(0)
        v = ((x - m) ** 2).mean(0)
        return (x - m) / jnp.sqrt(v + 1e-5) * g + bta

    h, a1 = tconv(x0, w1, b1)
    h = jax.nn.relu(bn(h, bng[0], bnb[0]))
    h2, a2 = tconv(h, w2, b2)
    out = jax.nn.relu(bn(h2, bng[1], bnb[1]) + x0)
    alpha1 = a1[dst, src][:, None]
    alpha2 = a2[dst, src][:, None]
    return out, (edges, alpha1 + alpha2)


if __name__ == "__main__":
    N, F, E = 16, 32, 48     # io_node_num == hidden_node_num == 32 (required by residual)

    key = jax.random.PRNGKey(0)
    ks = jax.random.split(key, 8)
    wscale = 1.0 / math.sqrt(F)
    # per conv: stacked [Wq, Wk, Wv, Wskip] ([4,F,F]) and biases ([4,F])
    w1 = jax.random.normal(ks[0], (4, F, F), jnp.float32) * wscale
    b1 = jax.random.normal(ks[1], (4, F), jnp.float32) * 0.1
    w2 = jax.random.normal(ks[2], (4, F, F), jnp.float32) * wscale
    b2 = jax.random.normal(ks[3], (4, F), jnp.float32) * 0.1
    # bn1 / bn2 affine params stacked as [2, F]
    bng = 1.0 + 0.1 * jax.random.normal(ks[4], (2, F), jnp.float32)
    bnb = 0.1 * jax.random.normal(ks[5], (2, F), jnp.float32)
    params = (w1, b1, w2, b2, bng, bnb)

    x0 = jax.random.normal(ks[6], (N, F), jnp.float32)
    # E distinct directed edges (duplicate-free -> dense mask is exact)
    perm = jax.random.permutation(ks[7], N * N)[:E]
    src = (perm // N).astype(jnp.int32)
    dst = (perm % N).astype(jnp.int32)
    edges = jnp.stack([src, dst])          # [2, E], row 0 = source, row 1 = target

    x_out, (e_out, alpha_sum) = conv_residual_block_forward(x0, edges, params)
    jax.block_until_ready((x_out, alpha_sum))

    x_ref, (_, alpha_ref) = reference_forward(x0, edges, params)
    np.testing.assert_allclose(np.asarray(x_out), np.asarray(x_ref),
                               rtol=1e-3, atol=1e-3)
    np.testing.assert_allclose(np.asarray(alpha_sum), np.asarray(alpha_ref),
                               rtol=1e-3, atol=1e-3)
    assert x_out.shape == (N, F) and alpha_sum.shape == (E, 1)
    print("KERNEL_OK")
</pallas_src>

<mosaic_0001>
module attributes {stable_mosaic.version = 11 : i64} {
  func.func @conv_residual_block_kernel(%arg0: i32, %arg1: memref<16x32xf32, #tpu.memory_space<vmem>>, %arg2: memref<16x16xbf16, #tpu.memory_space<vmem>>, %arg3: memref<32x128xf32, #tpu.memory_space<vmem>>, %arg4: memref<1x128xf32, #tpu.memory_space<vmem>>, %arg5: memref<32x128xf32, #tpu.memory_space<vmem>>, %arg6: memref<1x128xf32, #tpu.memory_space<vmem>>, %arg7: memref<2x32xf32, #tpu.memory_space<vmem>>, %arg8: memref<2x32xf32, #tpu.memory_space<vmem>>, %arg9: memref<16x32xf32, #tpu.memory_space<vmem>>, %arg10: memref<16x16xf32, #tpu.memory_space<vmem>>) attributes {dimension_semantics = [#tpu.dimension_semantics<arbitrary>], iteration_bounds = array<i64: 1>, scalar_prefetch = 0 : i64, scratch_operands = 0 : i64, tpu.core_type = #tpu.core_type<tc>, window_params = [{pipeline_mode = #tpu.pipeline_mode<synchronous>, transform_indices = @transform_0, window_bounds = array<i64: 16, 32>}, {pipeline_mode = #tpu.pipeline_mode<synchronous>, transform_indices = @transform_1, window_bounds = array<i64: 16, 16>}, {pipeline_mode = #tpu.pipeline_mode<synchronous>, transform_indices = @transform_2, window_bounds = array<i64: 32, 128>}, {pipeline_mode = #tpu.pipeline_mode<synchronous>, transform_indices = @transform_3, window_bounds = array<i64: 1, 128>}, {pipeline_mode = #tpu.pipeline_mode<synchronous>, transform_indices = @transform_4, window_bounds = array<i64: 32, 128>}, {pipeline_mode = #tpu.pipeline_mode<synchronous>, transform_indices = @transform_5, window_bounds = array<i64: 1, 128>}, {pipeline_mode = #tpu.pipeline_mode<synchronous>, transform_indices = @transform_6, window_bounds = array<i64: 2, 32>}, {pipeline_mode = #tpu.pipeline_mode<synchronous>, transform_indices = @transform_7, window_bounds = array<i64: 2, 32>}, {pipeline_mode = #tpu.pipeline_mode<synchronous>, transform_indices = @transform_8, window_bounds = array<i64: 16, 32>}, {pipeline_mode = #tpu.pipeline_mode<synchronous>, transform_indices = @transform_9, window_bounds = array<i64: 16, 16>}]} {
    %c0 = arith.constant 0 : index
    %c0_0 = arith.constant 0 : index
    %0 = vector.load %arg1[%c0, %c0_0] : memref<16x32xf32, #tpu.memory_space<vmem>>, vector<16x32xf32>
    %c0_1 = arith.constant 0 : index
    %c0_2 = arith.constant 0 : index
    %1 = vector.load %arg2[%c0_1, %c0_2] : memref<16x16xbf16, #tpu.memory_space<vmem>>, vector<16x16xbf16>
    %cst = arith.constant 0.000000e+00 : bf16
    %2 = vector.broadcast %cst : bf16 to vector<16x16xbf16>
    %3 = arith.cmpf ogt, %1, %2 : vector<16x16xbf16>
    %c0_3 = arith.constant 0 : index
    %c0_4 = arith.constant 0 : index
    %4 = vector.load %arg3[%c0_3, %c0_4] : memref<32x128xf32, #tpu.memory_space<vmem>>, vector<32x128xf32>
    %cst_5 = arith.constant dense<0.000000e+00> : vector<16x128xf32>
    %5 = tpu.matmul %0, %4, %cst_5 {dimension_numbers = #tpu.dot_dimension_numbers<[1], [0], [0], [1], [0, 0, 1, 1], [], []>} : vector<16x32xf32>, vector<32x128xf32>, vector<16x128xf32> -> vector<16x128xf32>
    %c0_6 = arith.constant 0 : index
    %c0_7 = arith.constant 0 : index
    %6 = vector.load %arg4[%c0_6, %c0_7] : memref<1x128xf32, #tpu.memory_space<vmem>>, vector<1x128xf32>
    %7 = vector.broadcast %6 : vector<1x128xf32> to vector<16x128xf32>
    %8 = arith.addf %5, %7 : vector<16x128xf32>
    %9 = vector.extract_strided_slice %8 {offsets = [0, 0], sizes = [16, 32], strides = [1, 1]} : vector<16x128xf32> to vector<16x32xf32>
    %10 = vector.extract_strided_slice %8 {offsets = [0, 32], sizes = [16, 32], strides = [1, 1]} : vector<16x128xf32> to vector<16x32xf32>
    %11 = vector.extract_strided_slice %8 {offsets = [0, 64], sizes = [16, 32], strides = [1, 1]} : vector<16x128xf32> to vector<16x32xf32>
    %12 = vector.extract_strided_slice %8 {offsets = [0, 96], sizes = [16, 32], strides = [1, 1]} : vector<16x128xf32> to vector<16x32xf32>
    "tpu.trace_start"() <{level = 10 : i32, message = "if,jf->ij"}> : () -> ()
    %cst_8 = arith.constant dense<0.000000e+00> : vector<16x16xf32>
    %13 = tpu.matmul %9, %10, %cst_8 {dimension_numbers = #tpu.dot_dimension_numbers<[1], [1], [0], [0], [0, 0, 1, 0], [], []>} : vector<16x32xf32>, vector<16x32xf32>, vector<16x16xf32> -> vector<16x16xf32>
    "tpu.trace_stop"() : () -> ()
    %cst_9 = arith.constant 0.176776692 : f32
    %14 = vector.broadcast %cst_9 : f32 to vector<16x16xf32>
    %15 = arith.mulf %13, %14 : vector<16x16xf32>
    %cst_10 = arith.constant -1.000000e+30 : f32
    %16 = vector.broadcast %cst_10 : f32 to vector<16x16xf32>
    %17 = arith.select %3, %15, %16 : vector<16x16xi1>, vector<16x16xf32>
    %cst_11 = arith.constant dense<0xFF800000> : vector<16xf32>
    %18 = vector.multi_reduction <maximumf>, %17, %cst_11 [1] : vector<16x16xf32> to vector<16xf32>
    %19 = vector.shape_cast %18 : vector<16xf32> to vector<16x1xf32>
    %20 = vector.broadcast %19 : vector<16x1xf32> to vector<16x16xf32>
    %21 = arith.subf %17, %20 : vector<16x16xf32>
    %22 = math.exp %21 : vector<16x16xf32>
    %cst_12 = arith.constant 0.000000e+00 : f32
    %23 = vector.broadcast %cst_12 : f32 to vector<16x16xf32>
    %24 = arith.select %3, %22, %23 : vector<16x16xi1>, vector<16x16xf32>
    %cst_13 = arith.constant dense<0.000000e+00> : vector<16xf32>
    %25 = vector.multi_reduction <add>, %24, %cst_13 [1] : vector<16x16xf32> to vector<16xf32>
    %26 = vector.shape_cast %25 : vector<16xf32> to vector<16x1xf32>
    %cst_14 = arith.constant 0.000000e+00 : f32
    %27 = vector.broadcast %cst_14 : f32 to vector<16x1xf32>
    %28 = arith.cmpf ogt, %26, %27 : vector<16x1xf32>
    %cst_15 = arith.constant 1.000000e+00 : f32
    %29 = vector.broadcast %cst_15 : f32 to vector<16x1xf32>
    %30 = arith.select %28, %26, %29 : vector<16x1xi1>, vector<16x1xf32>
    %31 = tpu.reciprocal %30 {approx = true} : vector<16x1xf32> -> vector<16x1xf32>
    %32 = arith.mulf %30, %31 : vector<16x1xf32>
    %cst_16 = arith.constant 2.000000e+00 : f32
    %33 = vector.broadcast %cst_16 : f32 to vector<16x1xf32>
    %34 = arith.subf %33, %32 : vector<16x1xf32>
    %35 = arith.mulf %31, %34 : vector<16x1xf32>
    %36 = vector.broadcast %35 : vector<16x1xf32> to vector<16x16xf32>
    %37 = arith.mulf %24, %36 : vector<16x16xf32>
    %cst_17 = arith.constant dense<0.000000e+00> : vector<16x32xf32>
    %38 = tpu.matmul %37, %11, %cst_17 {dimension_numbers = #tpu.dot_dimension_numbers<[1], [0], [0], [1], [0, 0, 1, 1], [], []>} : vector<16x16xf32>, vector<16x32xf32>, vector<16x32xf32> -> vector<16x32xf32>
    %39 = arith.addf %38, %12 : vector<16x32xf32>
    %c0_18 = arith.constant 0 : index
    %c0_19 = arith.constant 0 : index
    %40 = vector.load %arg10[%c0_18, %c0_19] : memref<16x16xf32, #tpu.memory_space<vmem>>, vector<16x16xf32>
    tpu.vector_store %arg10[%c0_18, %c0_19], %37 {strides = array<i32>} : memref<16x16xf32, #tpu.memory_space<vmem>>, vector<16x16xf32>,
    %c0_20 = arith.constant 0 : index
    %c0_21 = arith.constant 0 : index
    %41 = vector.load %arg7[%c0_20, %c0_21] : memref<2x32xf32, #tpu.memory_space<vmem>>, vector<1x32xf32>
    %c0_22 = arith.constant 0 : index
    %c0_23 = arith.constant 0 : index
    %42 = vector.load %arg8[%c0_22, %c0_23] : memref<2x32xf32, #tpu.memory_space<vmem>>, vector<1x32xf32>
    %cst_24 = arith.constant dense<0.000000e+00> : vector<32xf32>
    %43 = vector.multi_reduction <add>, %39, %cst_24 [0] : vector<16x32xf32> to vector<32xf32>
    %44 = vector.shape_cast %43 : vector<32xf32> to vector<1x32xf32>
    %45 = arith.mulf %39, %39 : vector<16x32xf32>
    %cst_25 = arith.constant dense<0.000000e+00> : vector<32xf32>
    %46 = vector.multi_reduction <add>, %45, %cst_25 [0] : vector<16x32xf32> to vector<32xf32>
    %47 = vector.shape_cast %46 : vector<32xf32> to vector<1x32xf32>
    %cst_26 = arith.constant 6.250000e-02 : f32
    %48 = vector.broadcast %cst_26 : f32 to vector<1x32xf32>
    %49 = arith.mulf %44, %48 : vector<1x32xf32>
    %cst_27 = arith.constant 6.250000e-02 : f32
    %50 = vector.broadcast %cst_27 : f32 to vector<1x32xf32>
    %51 = arith.mulf %47, %50 : vector<1x32xf32>
    %52 = arith.mulf %49, %49 : vector<1x32xf32>
    %53 = arith.subf %51, %52 : vector<1x32xf32>
    %cst_28 = arith.constant 0.000000e+00 : f32
    %54 = vector.broadcast %cst_28 : f32 to vector<1x32xf32>
    %55 = arith.maximumf %53, %54 : vector<1x32xf32>
    %56 = vector.broadcast %49 : vector<1x32xf32> to vector<16x32xf32>
    %57 = arith.subf %39, %56 : vector<16x32xf32>
    %cst_29 = arith.constant 9.99999974E-6 : f32
    %58 = vector.broadcast %cst_29 : f32 to vector<1x32xf32>
    %59 = arith.addf %55, %58 : vector<1x32xf32>
    %60 = math.rsqrt %59 : vector<1x32xf32>
    %61 = vector.broadcast %60 : vector<1x32xf32> to vector<16x32xf32>
    %62 = arith.mulf %57, %61 : vector<16x32xf32>
    %63 = vector.broadcast %41 : vector<1x32xf32> to vector<16x32xf32>
    %64 = arith.mulf %62, %63 : vector<16x32xf32>
    %65 = vector.broadcast %42 : vector<1x32xf32> to vector<16x32xf32>
    %66 = arith.addf %64, %65 : vector<16x32xf32>
    %cst_30 = arith.constant 0.000000e+00 : f32
    %67 = vector.broadcast %cst_30 : f32 to vector<16x32xf32>
    %68 = arith.maximumf %66, %67 : vector<16x32xf32>
    %c0_31 = arith.constant 0 : index
    %c0_32 = arith.constant 0 : index
    %69 = vector.load %arg5[%c0_31, %c0_32] : memref<32x128xf32, #tpu.memory_space<vmem>>, vector<32x128xf32>
    %cst_33 = arith.constant dense<0.000000e+00> : vector<16x128xf32>
    %70 = tpu.matmul %68, %69, %cst_33 {dimension_numbers = #tpu.dot_dimension_numbers<[1], [0], [0], [1], [0, 0, 1, 1], [], []>} : vector<16x32xf32>, vector<32x128xf32>, vector<16x128xf32> -> vector<16x128xf32>
    %c0_34 = arith.constant 0 : index
    %c0_35 = arith.constant 0 : index
    %71 = vector.load %arg6[%c0_34, %c0_35] : memref<1x128xf32, #tpu.memory_space<vmem>>, vector<1x128xf32>
    %72 = vector.broadcast %71 : vector<1x128xf32> to vector<16x128xf32>
    %73 = arith.addf %70, %72 : vector<16x128xf32>
    %74 = vector.extract_strided_slice %73 {offsets = [0, 0], sizes = [16, 32], strides = [1, 1]} : vector<16x128xf32> to vector<16x32xf32>
    %75 = vector.extract_strided_slice %73 {offsets = [0, 32], sizes = [16, 32], strides = [1, 1]} : vector<16x128xf32> to vector<16x32xf32>
    %76 = vector.extract_strided_slice %73 {offsets = [0, 64], sizes = [16, 32], strides = [1, 1]} : vector<16x128xf32> to vector<16x32xf32>
    %77 = vector.extract_strided_slice %73 {offsets = [0, 96], sizes = [16, 32], strides = [1, 1]} : vector<16x128xf32> to vector<16x32xf32>
    "tpu.trace_start"() <{level = 10 : i32, message = "if,jf->ij"}> : () -> ()
    %cst_36 = arith.constant dense<0.000000e+00> : vector<16x16xf32>
    %78 = tpu.matmul %74, %75, %cst_36 {dimension_numbers = #tpu.dot_dimension_numbers<[1], [1], [0], [0], [0, 0, 1, 0], [], []>} : vector<16x32xf32>, vector<16x32xf32>, vector<16x16xf32> -> vector<16x16xf32>
    "tpu.trace_stop"() : () -> ()
    %cst_37 = arith.constant 0.176776692 : f32
    %79 = vector.broadcast %cst_37 : f32 to vector<16x16xf32>
    %80 = arith.mulf %78, %79 : vector<16x16xf32>
    %cst_38 = arith.constant -1.000000e+30 : f32
    %81 = vector.broadcast %cst_38 : f32 to vector<16x16xf32>
    %82 = arith.select %3, %80, %81 : vector<16x16xi1>, vector<16x16xf32>
    %cst_39 = arith.constant dense<0xFF800000> : vector<16xf32>
    %83 = vector.multi_reduction <maximumf>, %82, %cst_39 [1] : vector<16x16xf32> to vector<16xf32>
    %84 = vector.shape_cast %83 : vector<16xf32> to vector<16x1xf32>
    %85 = vector.broadcast %84 : vector<16x1xf32> to vector<16x16xf32>
    %86 = arith.subf %82, %85 : vector<16x16xf32>
    %87 = math.exp %86 : vector<16x16xf32>
    %cst_40 = arith.constant 0.000000e+00 : f32
    %88 = vector.broadcast %cst_40 : f32 to vector<16x16xf32>
    %89 = arith.select %3, %87, %88 : vector<16x16xi1>, vector<16x16xf32>
    %cst_41 = arith.constant dense<0.000000e+00> : vector<16xf32>
    %90 = vector.multi_reduction <add>, %89, %cst_41 [1] : vector<16x16xf32> to vector<16xf32>
    %91 = vector.shape_cast %90 : vector<16xf32> to vector<16x1xf32>
    %cst_42 = arith.constant 0.000000e+00 : f32
    %92 = vector.broadcast %cst_42 : f32 to vector<16x1xf32>
    %93 = arith.cmpf ogt, %91, %92 : vector<16x1xf32>
    %cst_43 = arith.constant 1.000000e+00 : f32
    %94 = vector.broadcast %cst_43 : f32 to vector<16x1xf32>
    %95 = arith.select %93, %91, %94 : vector<16x1xi1>, vector<16x1xf32>
    %96 = tpu.reciprocal %95 {approx = true} : vector<16x1xf32> -> vector<16x1xf32>
    %97 = arith.mulf %95, %96 : vector<16x1xf32>
    %cst_44 = arith.constant 2.000000e+00 : f32
    %98 = vector.broadcast %cst_44 : f32 to vector<16x1xf32>
    %99 = arith.subf %98, %97 : vector<16x1xf32>
    %100 = arith.mulf %96, %99 : vector<16x1xf32>
    %101 = vector.broadcast %100 : vector<16x1xf32> to vector<16x16xf32>
    %102 = arith.mulf %89, %101 : vector<16x16xf32>
    %cst_45 = arith.constant dense<0.000000e+00> : vector<16x32xf32>
    %103 = tpu.matmul %102, %76, %cst_45 {dimension_numbers = #tpu.dot_dimension_numbers<[1], [0], [0], [1], [0, 0, 1, 1], [], []>} : vector<16x16xf32>, vector<16x32xf32>, vector<16x32xf32> -> vector<16x32xf32>
    %104 = arith.addf %103, %77 : vector<16x32xf32>
    %c0_46 = arith.constant 0 : index
    %c0_47 = arith.constant 0 : index
    %105 = vector.load %arg10[%c0_46, %c0_47] : memref<16x16xf32, #tpu.memory_space<vmem>>, vector<16x16xf32>
    %106 = arith.addf %105, %102 : vector<16x16xf32>
    %c0_48 = arith.constant 0 : index
    %c0_49 = arith.constant 0 : index
    %107 = vector.load %arg10[%c0_48, %c0_49] : memref<16x16xf32, #tpu.memory_space<vmem>>, vector<16x16xf32>
    tpu.vector_store %arg10[%c0_48, %c0_49], %106 {strides = array<i32>} : memref<16x16xf32, #tpu.memory_space<vmem>>, vector<16x16xf32>,
    %c1 = arith.constant 1 : index
    %c0_50 = arith.constant 0 : index
    %108 = vector.load %arg7[%c1, %c0_50] : memref<2x32xf32, #tpu.memory_space<vmem>>, vector<1x32xf32>
    %c1_51 = arith.constant 1 : index
    %c0_52 = arith.constant 0 : index
    %109 = vector.load %arg8[%c1_51, %c0_52] : memref<2x32xf32, #tpu.memory_space<vmem>>, vector<1x32xf32>
    %cst_53 = arith.constant dense<0.000000e+00> : vector<32xf32>
    %110 = vector.multi_reduction <add>, %104, %cst_53 [0] : vector<16x32xf32> to vector<32xf32>
    %111 = vector.shape_cast %110 : vector<32xf32> to vector<1x32xf32>
    %112 = arith.mulf %104, %104 : vector<16x32xf32>
    %cst_54 = arith.constant dense<0.000000e+00> : vector<32xf32>
    %113 = vector.multi_reduction <add>, %112, %cst_54 [0] : vector<16x32xf32> to vector<32xf32>
    %114 = vector.shape_cast %113 : vector<32xf32> to vector<1x32xf32>
    %cst_55 = arith.constant 6.250000e-02 : f32
    %115 = vector.broadcast %cst_55 : f32 to vector<1x32xf32>
    %116 = arith.mulf %111, %115 : vector<1x32xf32>
    %cst_56 = arith.constant 6.250000e-02 : f32
    %117 = vector.broadcast %cst_56 : f32 to vector<1x32xf32>
    %118 = arith.mulf %114, %117 : vector<1x32xf32>
    %119 = arith.mulf %116, %116 : vector<1x32xf32>
    %120 = arith.subf %118, %119 : vector<1x32xf32>
    %cst_57 = arith.constant 0.000000e+00 : f32
    %121 = vector.broadcast %cst_57 : f32 to vector<1x32xf32>
    %122 = arith.maximumf %120, %121 : vector<1x32xf32>
    %123 = vector.broadcast %116 : vector<1x32xf32> to vector<16x32xf32>
    %124 = arith.subf %104, %123 : vector<16x32xf32>
    %cst_58 = arith.constant 9.99999974E-6 : f32
    %125 = vector.broadcast %cst_58 : f32 to vector<1x32xf32>
    %126 = arith.addf %122, %125 : vector<1x32xf32>
    %127 = math.rsqrt %126 : vector<1x32xf32>
    %128 = vector.broadcast %127 : vector<1x32xf32> to vector<16x32xf32>
    %129 = arith.mulf %124, %128 : vector<16x32xf32>
    %130 = vector.broadcast %108 : vector<1x32xf32> to vector<16x32xf32>
    %131 = arith.mulf %129, %130 : vector<16x32xf32>
    %132 = vector.broadcast %109 : vector<1x32xf32> to vector<16x32xf32>
    %133 = arith.addf %131, %132 : vector<16x32xf32>
    %134 = arith.addf %133, %0 : vector<16x32xf32>
    %cst_59 = arith.constant 0.000000e+00 : f32
    %135 = vector.broadcast %cst_59 : f32 to vector<16x32xf32>
    %136 = arith.maximumf %134, %135 : vector<16x32xf32>
    %c0_60 = arith.constant 0 : index
    %c0_61 = arith.constant 0 : index
    %137 = vector.load %arg9[%c0_60, %c0_61] : memref<16x32xf32, #tpu.memory_space<vmem>>, vector<16x32xf32>
    tpu.vector_store %arg9[%c0_60, %c0_61], %136 {strides = array<i32>} : memref<16x32xf32, #tpu.memory_space<vmem>>, vector<16x32xf32>,
    return
  }
  func.func @transform_0(%arg0: i32) -> (i32, i32) {
    %c0_i32 = arith.constant 0 : i32
    %c0_i32_0 = arith.constant 0 : i32
    %c0_i32_1 = arith.constant 0 : i32
    return %c0_i32, %c0_i32_0 : i32, i32
  }
  func.func @transform_1(%arg0: i32) -> (i32, i32) {
    %c0_i32 = arith.constant 0 : i32
    %c0_i32_0 = arith.constant 0 : i32
    %c0_i32_1 = arith.constant 0 : i32
    return %c0_i32, %c0_i32_0 : i32, i32
  }
  func.func @transform_2(%arg0: i32) -> (i32, i32) {
    %c0_i32 = arith.constant 0 : i32
    %c0_i32_0 = arith.constant 0 : i32
    %c0_i32_1 = arith.constant 0 : i32
    return %c0_i32, %c0_i32_0 : i32, i32
  }
  func.func @transform_3(%arg0: i32) -> (i32, i32) {
    %c0_i32 = arith.constant 0 : i32
    %c0_i32_0 = arith.constant 0 : i32
    %c0_i32_1 = arith.constant 0 : i32
    return %c0_i32, %c0_i32_0 : i32, i32
  }
  func.func @transform_4(%arg0: i32) -> (i32, i32) {
    %c0_i32 = arith.constant 0 : i32
    %c0_i32_0 = arith.constant 0 : i32
    %c0_i32_1 = arith.constant 0 : i32
    return %c0_i32, %c0_i32_0 : i32, i32
  }
  func.func @transform_5(%arg0: i32) -> (i32, i32) {
    %c0_i32 = arith.constant 0 : i32
    %c0_i32_0 = arith.constant 0 : i32
    %c0_i32_1 = arith.constant 0 : i32
    return %c0_i32, %c0_i32_0 : i32, i32
  }
  func.func @transform_6(%arg0: i32) -> (i32, i32) {
    %c0_i32 = arith.constant 0 : i32
    %c0_i32_0 = arith.constant 0 : i32
    %c0_i32_1 = arith.constant 0 : i32
    return %c0_i32, %c0_i32_0 : i32, i32
  }
  func.func @transform_7(%arg0: i32) -> (i32, i32) {
    %c0_i32 = arith.constant 0 : i32
    %c0_i32_0 = arith.constant 0 : i32
    %c0_i32_1 = arith.constant 0 : i32
    return %c0_i32, %c0_i32_0 : i32, i32
  }
  func.func @transform_8(%arg0: i32) -> (i32, i32) {
    %c0_i32 = arith.constant 0 : i32
    %c0_i32_0 = arith.constant 0 : i32
    %c0_i32_1 = arith.constant 0 : i32
    return %c0_i32, %c0_i32_0 : i32, i32
  }
  func.func @transform_9(%arg0: i32) -> (i32, i32) {
    %c0_i32 = arith.constant 0 : i32
    %c0_i32_0 = arith.constant 0 : i32
    %c0_i32_1 = arith.constant 0 : i32
    return %c0_i32, %c0_i32_0 : i32, i32
  }
}

</mosaic_0001>

<bundles_post_ra>
// kernel: tpu_custom_call.1
= control target key start
LH: loop header
LB: loop body
LE: loop exit
PB: predicated region body
PF: predicated region fallthrough
CT: control target
= control target key end

     0   :  { %15 = vsyncpa [#allocation3], 0  ;;  %s1466_s0 = inlined_call_operand.hbm [shape: f32[16,32], index: 0, kind: input, shape index: {}]   ;;  %s1467_s1 = inlined_call_operand.hbm [shape: bf16[16,16], index: 1, kind: input, shape index: {}]   ;;  %s1468_s2 = inlined_call_operand.hbm [shape: f32[32,128], index: 2, kind: input, shape index: {}]   ;;  %s1469_s3 = inlined_call_operand.vmem [shape: f32[1,128], index: 3, kind: input, shape index: {}]   ;;  %s1470_s4 = inlined_call_operand.hbm [shape: f32[32,128], index: 4, kind: input, shape index: {}]   ;;  %s1471_s5 = inlined_call_operand.vmem [shape: f32[1,128], index: 5, kind: input, shape index: {}]   ;;  %s1472_s6 = inlined_call_operand.vmem [shape: f32[2,32], index: 6, kind: input, shape index: {}]   ;;  %s1473_s7 = inlined_call_operand.vmem [shape: f32[2,32], index: 7, kind: input, shape index: {}]   ;;  %s1474_s8 = inlined_call_operand.hbm [shape: f32[16,32], index: 8, kind: output, shape index: {0}]   ;;  %s1475_s9 = inlined_call_operand.hbm [shape: f32[16,16], index: 9, kind: output, shape index: {1}]  }
   0x1   :  { %16 = vsyncpa [#allocation6], 0 }
   0x2   :  { %17 = vsyncpa [#allocation9], 0 }
   0x3   :  { %18 = vsyncpa [#allocation4], 0 }
   0x4   :  { %19 = vsyncpa [#allocation12], 0  ;;  %s1201_s30 = smov [#allocation5]   ;;  %s1059_s13 = scalar_lea.hbm %s1467_s1, 128 }
   0x5   :  { %s37_s10 = sshll.u32 %s1201_s30, 4  ;;  %p1060_p0 = scmp.ne.s32.totalorder %s1467_s1, %s1059_s13  ;;  %s38_s10 = int_to_ptr.vmem [resolvable:$true] %s37_s10 }
   0x6   :  { %p1063_p1 = scmp.lt.u32.totalorder %s1059_s13, %s1467_s1 }
   0x8   :  { %p1065_p2 = pnand %p1063_p1, %p1060_p0 }
   0xa   :  { %1068 = shalt.err (!%p1065_p2)
}
   0xb   :  { %s1069_s18 = scalar_lea.vmem %s38_s10, 128  ;;  %p1074_p4 = scmp.lt.s32.totalorder %s38_s10, %s38_s10 }
   0xc   :  { %p1070_p3 = scmp.ne.s32.totalorder %s38_s10, %s1069_s18  ;;  %p1075_p5 = scmp.lt.s32.totalorder %s1069_s18, %s1069_s18 }
   0xe   :  { %p1076_p6 = por %p1075_p5, %p1074_p4 }
  0x10   :  { %p1077_p7 = pnand %p1076_p6, %p1070_p3 }
  0x12   :  { %1080 = shalt.err (!%p1077_p7)
}
  0x13   :  { %s1202_s19 = smov 64   ;;  %s1203_s20 = smov 4  }
  0x14   :  { %43 = dma.hbm_to_vmem [thread:$0]  %s1467_s1, 128, %s38_s10, [#allocation6], %s1202_s19, %s1202_s19, %s1203_s20  }
  0x15   :  { %s1204_s23 = smov [#allocation2]   ;;  %s1081_s27 = scalar_lea.hbm %s1466_s0, 256 }
  0x16   :  { %s25_s24 = sshll.u32 %s1204_s23, 4  ;;  %p1082_p8 = scmp.ne.s32.totalorder %s1466_s0, %s1081_s27  ;;  %s26_s24 = int_to_ptr.vmem [resolvable:$true] %s25_s24 }
  0x17   :  { %p1085_p9 = scmp.lt.u32.totalorder %s1081_s27, %s1466_s0 }
  0x19   :  { %p1087_p10 = pnand %p1085_p9, %p1082_p8 }
  0x1b   :  { %1090 = shalt.err (!%p1087_p10)
}
  0x1c   :  { %s1091_s12 = scalar_lea.vmem %s26_s24, 256  ;;  %p1096_p12 = scmp.lt.s32.totalorder %s26_s24, %s26_s24 }
  0x1d   :  { %p1092_p11 = scmp.ne.s32.totalorder %s26_s24, %s1091_s12  ;;  %p1097_p13 = scmp.lt.s32.totalorder %s1091_s12, %s1091_s12 }
  0x1f   :  { %p1098_p0 = por %p1097_p13, %p1096_p12 }
  0x21   :  { %p1099_p1 = pnand %p1098_p0, %p1092_p11 }
  0x23   :  { %1102 = shalt.err (!%p1099_p1)
}
  0x24   :  { %s1205_s1 = smov 128   ;;  %s1206_s10 = smov 8  }
  0x25   :  { %31 = dma.hbm_to_vmem [thread:$0]  %s1466_s0, 256, %s26_s24, [#allocation3], %s1205_s1, %s1205_s1, %s1206_s10  }
  0x26   :  { %s1207_s15 = smov [#allocation7]   ;;  %s1208_s17 = smov [#allocation8]  }
  0x27   :  { %s49_s16 = sshll.u32 %s1207_s15, 4  ;;  %s63_s18 = sshll.u32 %s1208_s17, 4  ;;  %s50_s16 = int_to_ptr.vmem [resolvable:$true] %s49_s16  ;;  %s1293_s18 = int_to_ptr.vmem [resolvable:$true] %s63_s18 }
  0x28   :  { %s1103_s22 = scalar_lea.hbm %s1468_s2, 512 }
  0x29   :  { %p1104_p2 = scmp.ne.s32.totalorder %s1468_s2, %s1103_s22  ;;  %p1107_p3 = scmp.lt.u32.totalorder %s1103_s22, %s1468_s2 }
  0x2b   :  { %p1109_p4 = pnand %p1107_p3, %p1104_p2 }
  0x2d   :  { %1112 = shalt.err (!%p1109_p4)
}
  0x2e   :  { %s1113_s0 = scalar_lea.vmem %s50_s16, 512  ;;  %p1118_p6 = scmp.lt.s32.totalorder %s50_s16, %s50_s16 }
  0x2f   :  { %p1114_p5 = scmp.ne.s32.totalorder %s50_s16, %s1113_s0  ;;  %p1119_p7 = scmp.lt.s32.totalorder %s1113_s0, %s1113_s0 }
  0x31   :  { %p1120_p8 = por %p1119_p7, %p1118_p6 }
  0x33   :  { %p1121_p9 = pnand %p1120_p8, %p1114_p5 }
  0x35   :  { %1124 = shalt.err (!%p1121_p9)
}
  0x36   :  { %55 = dma.hbm_to_vmem [thread:$0]  %s1468_s2, 512, %s50_s16, [#allocation6], %s1205_s1, %s1205_s1, %s1206_s10  }
  0x37   :  { %s1125_s11 = scalar_lea.hbm %s1470_s4, 512 }
  0x38   :  { %p1126_p10 = scmp.ne.s32.totalorder %s1470_s4, %s1125_s11  ;;  %p1129_p11 = scmp.lt.u32.totalorder %s1125_s11, %s1470_s4 }
  0x3a   :  { %p1131_p12 = pnand %p1129_p11, %p1126_p10 }
  0x3c   :  { %1134 = shalt.err (!%p1131_p12)
}
  0x3d   :  { %s1135_s17 = scalar_lea.vmem %s1293_s18, 512  ;;  %p1140_p0 = scmp.lt.s32.totalorder %s1293_s18, %s1293_s18 }
  0x3e   :  { %p1136_p13 = scmp.ne.s32.totalorder %s1293_s18, %s1135_s17  ;;  %p1141_p1 = scmp.lt.s32.totalorder %s1135_s17, %s1135_s17 }
  0x40   :  { %p1142_p2 = por %p1141_p1, %p1140_p0 }
  0x42   :  { %p1143_p3 = pnand %p1142_p2, %p1136_p13 }
  0x44   :  { %1146 = shalt.err (!%p1143_p3)
}
  0x45   :  { %69 = dma.hbm_to_vmem [thread:$0]  %s1470_s4, 512, %s1293_s18, [#allocation9], %s1205_s1, %s1205_s1, %s1206_s10  }
  0x46   :  { %1191 = dma.done.wait [#allocation3], 256  }
  0x47   :  { %1192 = vsyncadd [#allocation3], 4294967040 }
  0x48   :  { %1193 = dma.done.wait [#allocation6], 640  }
  0x49   :  { %1194 = vsyncadd [#allocation6], 4294966656 }
  0x4a   :  { %1195 = dma.done.wait [#allocation9], 512  }
  0x4b   :  { %1196 = vsyncadd [#allocation9], 4294966784  ;;  %vm108_vm0 = vcmask 261120   ;;  %v97_v0 = vld [vmem:[#allocation7] sm:$0xff]  ;;  %v98_v1 = vld [vmem:[#allocation7 + $0x8] sm:$0xff]  ;;  %s1209_s20 = smov 96  }
  0x4c   :  { %v99_v2 = vld [vmem:[#allocation7 + $0x10] sm:$0xff]  ;;  %v970_v3 = vpack.c.bf16 %v98_v1, %v97_v0  ;;  %v100_v4 = vld [vmem:[#allocation7 + $0x18] sm:$0xff]  ;;  %v1330_v5 = vld [vmem:[#allocation2] sm:$0xff]  ;;  %v1210_v21 = vmov 0   ;;  %vm289_vm5 = vcmask 130048  }
  0x4d   :  { %v974_v6 = vpack.c.bf16 %v100_v4, %v99_v2  ;;  %928 = vmatprep.mubr.msk.f32.mxu0 %vm108_vm0, %v1330_v5  ;;  %v1334_v7 = vld [vmem:[#allocation2 + $0x8] sm:$0xff]  ;;  %v870_v8 = vld [vmem:[%s1469_s3] ss:$0 sm:$0xff]  ;;  %vm1345_vm1 = vmpackc.low %vm108_vm0, %vm108_vm0  ;;  %s1211_s3 = smov 32  }
  0x4e   :  { %971 = vmatprep.subr.bf16.mxu0 %v970_v3  ;;  %v94_v19 = vld [vmem:[#allocation5 + $0x4] sm:$0xf]  ;;  %v93_v20 = vld [vmem:[#allocation5] sm:$0xf]  ;;  %v466_v2 = vld [vmem:[#allocation8] sm:$0xff] }
  0x4f   :  { %973 = vmatpush3.bf16.msra.mxu0 %v970_v3  ;;  %vm96_vm2 = vcmp.gt.bf16.partialorder %v94_v19, 0  ;;  %vm95_vm3 = vcmp.gt.bf16.partialorder %v93_v20, 0  ;;  %v467_v3 = vld [vmem:[#allocation8 + $0x8] sm:$0xff] }
  0x50   :  { %975 = vmatprep.subr.bf16.mxu0 %v974_v6  ;;  %v282_v22 = vsel %vm96_vm2, 65537, %v1210_v21  ;;  %v281_v23 = vsel %vm95_vm3, 65537, %v1210_v21  ;;  %v988_v4 = vpack.c.bf16 %v467_v3, %v466_v2 }
  0x51   :  { %v284_v24 = vunpack.c.l.b16 %v282_v22  ;;  %v283_v25 = vunpack.c.l.b16 %v281_v23 }
  0x53   :  { %977 = vmatpush3.bf16.msra.mxu0 %v974_v6  ;;  %vm1354_vm4 = vcmp.ne.s32.totalorder %v284_v24, 0  ;;  %vm1358_vm6 = vcmp.ne.s32.totalorder %v283_v25, 0  ;;  %v468_v6 = vld [vmem:[#allocation8 + $0x10] sm:$0xff] }
  0x56   :  { %929 = vmatmul.mubr.msk.f32.vlgmr.msra.gmra.mrb[0].mxu0 %vm108_vm0, %v1334_v7 }
 0x129   :  { %v930_v9 = vpop.f32.mrb[0].mxu0 }
 0x12a   :  { %v187_v10 = vadd.f32 %v930_v9, %v870_v8  ;;  %v181_v11 = vpop.f32.mrb[1].mxu0 }
 0x12b   :  { %v182_v12 = vadd.f32 %v870_v8, %v181_v11  ;;  %v469_v8 = vld [vmem:[#allocation8 + $0x18] sm:$0xff] }
 0x12c   :  { %v992_v9 = vpack.c.bf16 %v469_v8, %v468_v6 }
 0x12d   :  { %935 = vmatprep.mubr.msk.f32.mxu1 %vm108_vm0, %v182_v12  ;;  %v1019_v13 = vpack.i.bf16 %v187_v10, %v182_v12 }
 0x12f   :  { %1020 = vrot.lane.b32.xlu0 %v1019_v13, %s1209_s20 }
 0x1a1   :  { %v1021_v14 = vpop.permute.xlu0 %1020 }
 0x1a2   :  { %v1023_v15 = vunpack.i.h.bf16 %v1021_v14  ;;  %v1022_v16 = vunpack.i.l.bf16 %v1021_v14 }
 0x1a4   :  { %v978_v18 = vpack.c.bf16 %v1023_v15, %v1022_v16 }
 0x1a6   :  { %980 = vmatprep.subr.msk.bf16.mxu1 %vm1345_vm1, %v978_v18 }
 0x1a7   :  { %983 = vmatpush3.bf16.xpose.msk.msra.mxu1 %vm1345_vm1, %v978_v18 }
 0x1a8   :  { %989 = vmatprep.subr.bf16.mxu1 %v988_v4 }
 0x1ae   :  { %936 = vmatmul.mubr.msk.f32.vlgmr.msra.gmra.mrb[0].mxu1 %vm108_vm0, %v187_v10 }
 0x1af   :  { %991 = vmatpush3.bf16.msra.mxu1 %v988_v4 }
 0x1b0   :  { %993 = vmatprep.subr.bf16.mxu1 %v992_v9 }
 0x1b3   :  { %995 = vmatpush3.bf16.msra.mxu1 %v992_v9 }
 0x281   :  { %v937_v26 = vpop.f32.mrb[0].mxu1 }
 0x282   :  { %v280_v28 = vmul.f32 0.17677669, %v937_v26  ;;  %v270_v29 = vpop.f32.mrb[1].mxu1 }
 0x283   :  { %v279_v31 = vmul.f32 0.17677669, %v270_v29 }
 0x284   :  { %v288_v32 = vsel %vm1354_vm4, %v280_v28, -1e+30 }
 0x285   :  { %v293_v33 = vsel %vm289_vm5, %v288_v32, -inf  ;;  %v287_v34 = vsel %vm1358_vm6, %v279_v31, -1e+30 }
 0x286   :  { %294 = vmax.xlane.f32.xlu1 %v293_v33  ;;  %v290_v35 = vsel %vm289_vm5, %v287_v34, -inf }
 0x287   :  { %291 = vmax.xlane.f32.xlu0 %v290_v35 }
 0x313   :  { %v295_v36 = vpop.xlane.xlu1 %294 }
 0x314   :  { %v297_v37 = vsub.f32 %v288_v32, %v295_v36  ;;  %v292_v38 = vpop.xlane.xlu0 %291 }
 0x315   :  { %v296_v39 = vsub.f32 %v287_v34, %v292_v38 }
 0x316   :  { %v300_v40 = vmul.f32 1.442695, %v297_v37 }
 0x317   :  { %v298_v41 = vmul.f32 1.442695, %v296_v39 }
 0x318   :  { %1039 = vpow2.f32 %v300_v40 }
 0x319   :  { %1041 = vpow2.f32 %v298_v41 }
 0x322   :  { %v1040_v42 = vpop.eup %1039 }
 0x323   :  { %v1042_v43 = vpop.eup %1041  ;;  %v303_v44 = vsel %vm1354_vm4, %v1040_v42, 0.0 }
 0x324   :  { %v307_v45 = vsel %vm289_vm5, %v303_v44, 0.0  ;;  %v302_v46 = vsel %vm1358_vm6, %v1042_v43, 0.0 }
 0x325   :  { %308 = vadd.xlane.f32.xlu1 %v307_v45  ;;  %v304_v47 = vsel %vm289_vm5, %v302_v46, 0.0 }
 0x329   :  { %305 = vadd.xlane.f32.xlu1 %v304_v47 }
 0x33a   :  { %1025 = vrot.lane.b32.xlu1 %v1019_v13, %s1202_s19 }
 0x33e   :  { %330 = vrot.lane.b32.xlu1 %v182_v12, %s1211_s3 }
 0x342   :  { %332 = vrot.lane.b32.xlu1 %v187_v10, %s1211_s3 }
 0x3b2   :  { %v309_v48 = vpop.xlane.xlu1 %308 }
 0x3b3   :  { %vm311_vm7 = vcmp.gt.f32.partialorder %v309_v48, 0.0 }
 0x3b4   :  { %v313_v49 = vsel %vm311_vm7, %v309_v48, 1.0  ;;  %v879_v48 = vld [vmem:[%s1472_s6] ss:$0 sm:$0xff] }
 0x3b5   :  { %1043 = vrcp.f32 %v313_v49 }
 0x3b6   :  { %v306_v50 = vpop.xlane.xlu1 %305 }
 0x3b7   :  { %vm310_vm8 = vcmp.gt.f32.partialorder %v306_v50, 0.0 }
 0x3b8   :  { %v312_v51 = vsel %vm310_vm8, %v306_v50, 1.0 }
 0x3b9   :  { %1045 = vrcp.f32 %v312_v51 }
 0x3ba   :  { %v1026_v52 = vpop.permute.xlu1 %1025 }
 0x3bb   :  { %v1028_v53 = vunpack.i.h.bf16 %v1026_v52  ;;  %v1027_v54 = vunpack.i.l.bf16 %v1026_v52 }
 0x3bd   :  { %v984_v55 = vpack.c.bf16 %v1028_v53, %v1027_v54 }
 0x3be   :  { %v331_v10 = vpop.permute.xlu1 %330 }
 0x3bf   :  { %v1044_v56 = vpop.eup %1043  ;;  %985 = vmatprep.subr.bf16.mxu0 %v984_v55 }
 0x3c0   :  { %v317_v57 = vmul.f32 %v1044_v56, %v313_v49  ;;  %987 = vmatpush3.bf16.msra.mxu0 %v984_v55 }
 0x3c2   :  { %v319_v58 = vsub.f32 2.0, %v317_v57  ;;  %v333_v11 = vpop.permute.xlu1 %332 }
 0x3c3   :  { %v1046_v59 = vpop.eup %1045 }
 0x3c4   :  { %v321_v60 = vmul.f32 %v1044_v56, %v319_v58  ;;  %v316_v61 = vmul.f32 %v1046_v59, %v312_v51  ;;  %v880_v51 = vld [vmem:[%s1473_s7] ss:$0 sm:$0xff] }
 0x3c5   :  { %v881_v58 = vld [vmem:[%s1471_s5] ss:$0 sm:$0xff]  ;;  %s1212_s5 = smov [#allocation11]  }
 0x3c6   :  { %v323_v62 = vmul.f32 %v321_v60, %v303_v44  ;;  %v318_v63 = vsub.f32 2.0, %v316_v61 }
 0x3c8   :  { %418 = vst.msk [vmem:[#allocation11 + $0x8] sm:$0xff] %vm289_vm5, %v323_v62  ;;  %v320_v0 = vmul.f32 %v1046_v59, %v318_v63 }
 0x3ca   :  { %v322_v1 = vmul.f32 %v320_v0, %v302_v46 }
 0x3cc   :  { %417 = vst.msk [vmem:[#allocation11] sm:$0xff] %vm289_vm5, %v322_v1  ;;  %942 = vmatprep.mubr.msk.f32.mxu0 %vm289_vm5, %v322_v1 }
 0x3cd   :  { %943 = vmatmul.mubr.msk.f32.vlgmr.msra.gmra.mrb[2].mxu0 %vm289_vm5, %v323_v62 }
 0x4a0   :  { %v944_v12 = vpop.f32.mrb[2].mxu0 }
 0x4a1   :  { %v414_v13 = vadd.f32 %v944_v12, %v333_v11  ;;  %v408_v14 = vpop.f32.mrb[3].mxu0 }
 0x4a2   :  { %v409_v15 = vadd.f32 %v408_v14, %v331_v10 }
 0x4a3   :  { %v422_v16 = vsel %vm108_vm0, %v414_v13, 0.0  ;;  %v431_v18 = vmul.f32 %v414_v13, %v414_v13 }
 0x4a4   :  { %v421_v19 = vsel %vm108_vm0, %v409_v15, 0.0  ;;  %v430_v20 = vmul.f32 %v409_v15, %v409_v15 }
 0x4a5   :  { %v433_v21 = vsel %vm108_vm0, %v431_v18, 0.0  ;;  %v423_v22 = vadd.f32 %v422_v16, %v421_v19 }
 0x4a6   :  { %v432_v23 = vsel %vm108_vm0, %v430_v20, 0.0 }
 0x4a7   :  { %v424_v24 = vrot.slane %v423_v22, 4  ;;  %v434_v25 = vadd.f32 %v433_v21, %v432_v23 }
 0x4a9   :  { %v425_v26 = vadd.f32 %v424_v24, %v423_v22  ;;  %v435_v28 = vrot.slane %v434_v25, 4 }
 0x4ab   :  { %v426_v29 = vrot.slane %v425_v26, 2  ;;  %v436_v31 = vadd.f32 %v435_v28, %v434_v25 }
 0x4ad   :  { %v427_v32 = vadd.f32 %v426_v29, %v425_v26  ;;  %v437_v33 = vrot.slane %v436_v31, 2 }
 0x4af   :  { %v428_v34 = vrot.slane %v427_v32, 1  ;;  %v438_v35 = vadd.f32 %v437_v33, %v436_v31 }
 0x4b1   :  { %v429_v36 = vadd.f32 %v428_v34, %v427_v32  ;;  %v439_v37 = vrot.slane %v438_v35, 1 }
 0x4b3   :  { %v440_v38 = vadd.f32 %v439_v37, %v438_v35  ;;  %v441_v39 = vmul.f32 0.0625, %v429_v36 }
 0x4b5   :  { %v442_v40 = vmul.f32 0.0625, %v440_v38  ;;  %v443_v41 = vmul.f32 %v441_v39, %v441_v39  ;;  %v446_v42 = vsub.f32 %v409_v15, %v441_v39  ;;  %v447_v43 = vsub.f32 %v414_v13, %v441_v39 }
 0x4b7   :  { %v444_v44 = vsub.f32 %v442_v40, %v443_v41 }
 0x4b9   :  { %v445_v45 = vmax.f32 %v444_v44, 0.0 }
 0x4bb   :  { %v448_v46 = vadd.f32 1e-05, %v445_v45 }
 0x4bd   :  { %1047 = vrsqrt.f32 %v448_v46  ;;  %v778_v46 = vld [vmem:[#allocation11] sm:$0xff] }
 0x4c7   :  { %v1048_v47 = vpop.eup %1047 }
 0x4c8   :  { %v450_v49 = vmul.f32 %v1048_v47, %v446_v42  ;;  %v451_v50 = vmul.f32 %v1048_v47, %v447_v43  ;;  %v779_v42 = vld [vmem:[#allocation11 + $0x8] sm:$0xff] }
 0x4ca   :  { %v456_v52 = vmul.f32 %v879_v48, %v450_v49  ;;  %v457_v53 = vmul.f32 %v879_v48, %v451_v50 }
 0x4cc   :  { %v462_v54 = vadd.f32 %v880_v51, %v456_v52  ;;  %v463_v55 = vadd.f32 %v880_v51, %v457_v53 }
 0x4ce   :  { %v464_v56 = vmax.f32 %v462_v54, 0.0  ;;  %v465_v57 = vmax.f32 %v463_v55, 0.0 }
 0x4d0   :  { %953 = vmatprep.mubr.msk.f32.mxu1 %vm108_vm0, %v464_v56 }
 0x4d1   :  { %954 = vmatmul.mubr.msk.f32.vlgmr.msra.gmra.mrb[2].mxu1 %vm108_vm0, %v465_v57 }
 0x5a4   :  { %v955_v59 = vpop.f32.mrb[2].mxu1 }
 0x5a5   :  { %v555_v60 = vadd.f32 %v955_v59, %v881_v58  ;;  %v549_v61 = vpop.f32.mrb[3].mxu1 }
 0x5a6   :  { %v550_v62 = vadd.f32 %v881_v58, %v549_v61 }
 0x5a8   :  { %960 = vmatprep.mubr.msk.f32.mxu0 %vm108_vm0, %v550_v62  ;;  %v1029_v63 = vpack.i.bf16 %v555_v60, %v550_v62 }
 0x5aa   :  { %1030 = vrot.lane.b32.xlu0 %v1029_v63, %s1209_s20 }
 0x61c   :  { %v1031_v0 = vpop.permute.xlu0 %1030 }
 0x61d   :  { %v1033_v1 = vunpack.i.h.bf16 %v1031_v0  ;;  %v1032_v2 = vunpack.i.l.bf16 %v1031_v0 }
 0x61f   :  { %v996_v3 = vpack.c.bf16 %v1033_v1, %v1032_v2 }
 0x621   :  { %998 = vmatprep.subr.msk.bf16.mxu0 %vm1345_vm1, %v996_v3 }
 0x622   :  { %1001 = vmatpush3.bf16.xpose.msk.msra.mxu0 %vm1345_vm1, %v996_v3 }
 0x629   :  { %961 = vmatmul.mubr.msk.f32.vlgmr.msra.gmra.mrb[4].mxu0 %vm108_vm0, %v555_v60 }
 0x6fc   :  { %v962_v4 = vpop.f32.mrb[4].mxu0 }
 0x6fd   :  { %v648_v6 = vmul.f32 0.17677669, %v962_v4  ;;  %v638_v8 = vpop.f32.mrb[5].mxu0 }
 0x6fe   :  { %v647_v9 = vmul.f32 0.17677669, %v638_v8 }
 0x6ff   :  { %v650_v10 = vsel %vm1354_vm4, %v648_v6, -1e+30 }
 0x700   :  { %v654_v11 = vsel %vm289_vm5, %v650_v10, -inf  ;;  %v649_v12 = vsel %vm1358_vm6, %v647_v9, -1e+30 }
 0x701   :  { %655 = vmax.xlane.f32.xlu0 %v654_v11  ;;  %v651_v13 = vsel %vm289_vm5, %v649_v12, -inf }
 0x702   :  { %652 = vmax.xlane.f32.xlu1 %v651_v13 }
 0x717   :  { %691 = vrot.lane.b32.xlu0 %v550_v62, %s1211_s3 }
 0x78e   :  { %v656_v17 = vpop.xlane.xlu0 %655 }
 0x78f   :  { %v658_v14 = vsub.f32 %v650_v10, %v656_v17  ;;  %v653_v15 = vpop.xlane.xlu1 %652 }
 0x790   :  { %v657_v16 = vsub.f32 %v649_v12, %v653_v15 }
 0x791   :  { %v661_v18 = vmul.f32 1.442695, %v658_v14 }
 0x792   :  { %v659_v19 = vmul.f32 1.442695, %v657_v16 }
 0x793   :  { %1049 = vpow2.f32 %v661_v18 }
 0x794   :  { %1051 = vpow2.f32 %v659_v19 }
 0x79d   :  { %v1050_v20 = vpop.eup %1049 }
 0x79e   :  { %v1052_v21 = vpop.eup %1051  ;;  %v664_v22 = vsel %vm1354_vm4, %v1050_v20, 0.0 }
 0x79f   :  { %v668_v23 = vsel %vm289_vm5, %v664_v22, 0.0  ;;  %v663_v24 = vsel %vm1358_vm6, %v1052_v21, 0.0 }
 0x7a0   :  { %669 = vadd.xlane.f32.xlu1 %v668_v23  ;;  %v665_v25 = vsel %vm289_vm5, %v663_v24, 0.0 }
 0x7a4   :  { %666 = vadd.xlane.f32.xlu1 %v665_v25 }
 0x7b5   :  { %1035 = vrot.lane.b32.xlu1 %v1029_v63, %s1202_s19  ;;  %s852_s19 = sshll.u32 %s1212_s5, 4  ;;  %s853_s19 = int_to_ptr.vmem [resolvable:$true] %s852_s19 }
 0x7b6   :  { %s1147_s0 = scalar_lea.vmem %s853_s19, 256  ;;  %p1152_p5 = scmp.lt.s32.totalorder %s853_s19, %s853_s19 }
 0x7b7   :  { %p1148_p4 = scmp.ne.s32.totalorder %s853_s19, %s1147_s0  ;;  %p1153_p6 = scmp.lt.s32.totalorder %s1147_s0, %s1147_s0 }
 0x7b9   :  { %693 = vrot.lane.b32.xlu1 %v555_v60, %s1211_s3  ;;  %p1154_p7 = por %p1153_p6, %p1152_p5 }
 0x7bb   :  { %p1155_p8 = pnand %p1154_p7, %p1148_p4 }
 0x82d   :  { %v670_v26 = vpop.xlane.xlu1 %669 }
 0x82e   :  { %vm672_vm9 = vcmp.gt.f32.partialorder %v670_v26, 0.0 }
 0x82f   :  { %v674_v28 = vsel %vm672_vm9, %v670_v26, 1.0 }
 0x830   :  { %1053 = vrcp.f32 %v674_v28 }
 0x831   :  { %v667_v29 = vpop.xlane.xlu1 %666 }
 0x832   :  { %vm671_vm10 = vcmp.gt.f32.partialorder %v667_v29, 0.0 }
 0x833   :  { %v673_v27 = vsel %vm671_vm10, %v667_v29, 1.0 }
 0x834   :  { %1055 = vrcp.f32 %v673_v27 }
 0x835   :  { %v1036_v31 = vpop.permute.xlu1 %1035 }
 0x836   :  { %v1038_v32 = vunpack.i.h.bf16 %v1036_v31  ;;  %v1037_v33 = vunpack.i.l.bf16 %v1036_v31 }
 0x838   :  { %v1002_v30 = vpack.c.bf16 %v1038_v32, %v1037_v33 }
 0x83a   :  { %v1054_v34 = vpop.eup %1053  ;;  %1003 = vmatprep.subr.bf16.mxu1 %v1002_v30 }
 0x83b   :  { %v678_v35 = vmul.f32 %v1054_v34, %v674_v28  ;;  %1005 = vmatpush3.bf16.msra.mxu1 %v1002_v30 }
 0x83d   :  { %v680_v36 = vsub.f32 2.0, %v678_v35 }
 0x83e   :  { %v1056_v37 = vpop.eup %1055 }
 0x83f   :  { %v682_v38 = vmul.f32 %v1054_v34, %v680_v36  ;;  %v677_v39 = vmul.f32 %v1056_v37, %v673_v27 }
 0x841   :  { %v684_v40 = vmul.f32 %v682_v38, %v664_v22  ;;  %v679_v41 = vsub.f32 2.0, %v677_v39 }
 0x843   :  { %v781_v43 = vadd.f32 %v779_v42, %v684_v40  ;;  %v681_v44 = vmul.f32 %v1056_v37, %v679_v41 }
 0x845   :  { %783 = vst.msk [vmem:[#allocation11 + $0x8] sm:$0xff] %vm289_vm5, %v781_v43  ;;  %v683_v45 = vmul.f32 %v681_v44, %v663_v24 }
 0x847   :  { %v780_v47 = vadd.f32 %v778_v46, %v683_v45  ;;  %967 = vmatprep.mubr.msk.f32.mxu1 %vm289_vm5, %v683_v45 }
 0x848   :  { %968 = vmatmul.mubr.msk.f32.vlgmr.msra.gmra.mrb[4].mxu1 %vm289_vm5, %v684_v40 }
 0x849   :  { %782 = vst.msk [vmem:[#allocation11] sm:$0xff] %vm289_vm5, %v780_v47 }
 0x84a   :  { %1158 = shalt.err (!%p1155_p8)
}
 0x84b   :  { %s1159_s29 = scalar_lea.hbm %s1475_s9, 256 }
 0x84c   :  { %p1160_p9 = scmp.ne.s32.totalorder %s1475_s9, %s1159_s29  ;;  %p1163_p10 = scmp.lt.u32.totalorder %s1159_s29, %s1475_s9 }
 0x84e   :  { %p1165_p11 = pnand %p1163_p10, %p1160_p9 }
 0x850   :  { %1168 = shalt.err (!%p1165_p11)
}
 0x851   :  { %858 = dma.vmem_to_hbm [thread:$0]  %s853_s19, 256, %s1475_s9, [#allocation12], %s1205_s1, %s1205_s1, %s1206_s10   ;;  %v694_v48 = vpop.permute.xlu1 %693  ;;  %v692_v50 = vpop.permute.xlu0 %691 }
 0x852   :  { %v890_v21 = vld [vmem:[%s1472_s6 + $0x1] ss:$0 sm:$0xff]  ;;  %s1213_s4 = smov [#allocation10]  }
 0x853   :  { %v891_v24 = vld [vmem:[%s1473_s7 + $0x1] ss:$0 sm:$0xff]  ;;  %s840_s18 = sshll.u32 %s1213_s4, 4  ;;  %s841_s18 = int_to_ptr.vmem [resolvable:$true] %s840_s18 }
 0x854   :  { %s1169_s6 = scalar_lea.vmem %s841_s18, 256  ;;  %p1174_p13 = scmp.lt.s32.totalorder %s841_s18, %s841_s18 }
 0x855   :  { %p1170_p12 = scmp.ne.s32.totalorder %s841_s18, %s1169_s6  ;;  %p1175_p0 = scmp.lt.s32.totalorder %s1169_s6, %s1169_s6 }
 0x857   :  { %p1176_p1 = por %p1175_p0, %p1174_p13 }
 0x859   :  { %p1177_p2 = pnand %p1176_p1, %p1170_p12 }
 0x91b   :  { %v969_v49 = vpop.f32.mrb[4].mxu1 }
 0x91c   :  { %v775_v51 = vadd.f32 %v969_v49, %v694_v48  ;;  %v769_v52 = vpop.f32.mrb[5].mxu1 }
 0x91d   :  { %v770_v53 = vadd.f32 %v769_v52, %v692_v50 }
 0x91e   :  { %v787_v54 = vsel %vm108_vm0, %v775_v51, 0.0  ;;  %v796_v55 = vmul.f32 %v775_v51, %v775_v51 }
 0x91f   :  { %v786_v56 = vsel %vm108_vm0, %v770_v53, 0.0  ;;  %v795_v57 = vmul.f32 %v770_v53, %v770_v53 }
 0x920   :  { %v798_v58 = vsel %vm108_vm0, %v796_v55, 0.0  ;;  %v788_v59 = vadd.f32 %v787_v54, %v786_v56 }
 0x921   :  { %v797_v60 = vsel %vm108_vm0, %v795_v57, 0.0 }
 0x922   :  { %v789_v61 = vrot.slane %v788_v59, 4  ;;  %v799_v62 = vadd.f32 %v798_v58, %v797_v60 }
 0x924   :  { %v790_v63 = vadd.f32 %v789_v61, %v788_v59  ;;  %v800_v0 = vrot.slane %v799_v62, 4 }
 0x926   :  { %v791_v1 = vrot.slane %v790_v63, 2  ;;  %v801_v2 = vadd.f32 %v800_v0, %v799_v62 }
 0x928   :  { %v792_v3 = vadd.f32 %v791_v1, %v790_v63  ;;  %v802_v4 = vrot.slane %v801_v2, 2 }
 0x92a   :  { %v793_v6 = vrot.slane %v792_v3, 1  ;;  %v803_v8 = vadd.f32 %v802_v4, %v801_v2 }
 0x92c   :  { %v794_v9 = vadd.f32 %v793_v6, %v792_v3  ;;  %v804_v10 = vrot.slane %v803_v8, 1 }
 0x92e   :  { %v805_v11 = vadd.f32 %v804_v10, %v803_v8  ;;  %v806_v12 = vmul.f32 0.0625, %v794_v9 }
 0x930   :  { %v807_v13 = vmul.f32 0.0625, %v805_v11  ;;  %v808_v17 = vmul.f32 %v806_v12, %v806_v12  ;;  %v811_v14 = vsub.f32 %v770_v53, %v806_v12  ;;  %v812_v15 = vsub.f32 %v775_v51, %v806_v12 }
 0x932   :  { %v809_v16 = vsub.f32 %v807_v13, %v808_v17 }
 0x934   :  { %v810_v18 = vmax.f32 %v809_v16, 0.0 }
 0x936   :  { %v813_v19 = vadd.f32 1e-05, %v810_v18 }
 0x938   :  { %1057 = vrsqrt.f32 %v813_v19 }
 0x942   :  { %v1058_v20 = vpop.eup %1057 }
 0x943   :  { %v815_v22 = vmul.f32 %v1058_v20, %v811_v14  ;;  %v816_v23 = vmul.f32 %v1058_v20, %v812_v15 }
 0x945   :  { %v821_v25 = vmul.f32 %v890_v21, %v815_v22  ;;  %v822_v26 = vmul.f32 %v890_v21, %v816_v23 }
 0x947   :  { %v827_v28 = vadd.f32 %v891_v24, %v821_v25  ;;  %v828_v29 = vadd.f32 %v891_v24, %v822_v26 }
 0x949   :  { %v829_v27 = vadd.f32 %v827_v28, %v1330_v5  ;;  %v830_v31 = vadd.f32 %v828_v29, %v1334_v7 }
 0x94b   :  { %v831_v32 = vmax.f32 %v829_v27, 0.0  ;;  %v832_v33 = vmax.f32 %v830_v31, 0.0 }
 0x94d   :  { %833 = vst.msk [vmem:[#allocation10] sm:$0xff] %vm108_vm0, %v831_v32  ;;  %834 = vst.msk [vmem:[#allocation10 + $0x8] sm:$0xff] %vm108_vm0, %v832_v33 }
 0x94e   :  { %1180 = shalt.err (!%p1177_p2)
}
 0x94f   :  { %s1181_s3 = scalar_lea.hbm %s1474_s8, 256 }
 0x950   :  { %p1182_p3 = scmp.ne.s32.totalorder %s1474_s8, %s1181_s3  ;;  %p1185_p4 = scmp.lt.u32.totalorder %s1181_s3, %s1474_s8 }
 0x952   :  { %p1187_p5 = pnand %p1185_p4, %p1182_p3 }
 0x954   :  { %1190 = shalt.err (!%p1187_p5)
}
 0x955   :  { %846 = dma.vmem_to_hbm [thread:$0]  %s841_s18, 256, %s1474_s8, [#allocation4], %s1205_s1, %s1205_s1, %s1206_s10  }
 0x956   :  { %1197 = dma.done.wait [#allocation4], 256  }
 0x957   :  { %1198 = vsyncadd [#allocation4], 4294967040 }
 0x958   :  { %1199 = dma.done.wait [#allocation12], 256  }
 0x959   :  { %1200 = vsyncadd [#allocation12], 4294967040 }
 0x95a   :  { %865 = vsyncpa [#allocation3], 1 }
 0x95b   :  { %866 = vsyncpa [#allocation6], 1 }
 0x95c   :  { %867 = vsyncpa [#allocation9], 1 }
 0x95d   :  { %868 = vsyncpa [#allocation4], 1 }
 0x95e   :  { %869 = vsyncpa [#allocation12], 1 }

</bundles_post_ra>
